<compile_context>
chip_gen: v6e
topology: v6e:2x2x1
jax: 0.10.0
libtpu: 0.0.40
codegen_flags: <defaults>
</compile_context>

<pallas_src>
import jax
import jax.numpy as jnp
import numpy as np
from jax.experimental import pallas as pl
from jax.experimental.pallas import tpu as pltpu


# ----------------------------------------------------------------------------
# Fused kernel: linear1 -> tanh -> linear2 -> softmax(S) -> weighted pooling
# ----------------------------------------------------------------------------
def _attention_pooling_kernel(x_ref, w1_ref, b1_ref, w2_ref, b2_ref,
                              pooled_ref, attn_ref):
    x = x_ref[...].astype(jnp.float32)                # (Nb, S, D)
    Nb, S, D = x.shape

    # --- attention_layer1 + tanh ---------------------------------------------
    # Collapse (Nb, S) -> M: one large matmul, bf16 operands at the MXU,
    # f32 accumulation.
    x2d = x.reshape(Nb * S, D)
    h = jnp.dot(x2d.astype(jnp.bfloat16),
                w1_ref[...].astype(jnp.bfloat16),
                preferred_element_type=jnp.float32) + b1_ref[...]
    h = jnp.tanh(h)                                   # EUP transcendental

    # --- attention_layer2 (output width 1) -------------------------------------
    # Lane-width-1 matmul wastes the MXU; use VPU multiply + lane reduce.
    h3 = h.reshape(Nb, S, D)
    scores = jnp.sum(h3 * w2_ref[...], axis=-1) + b2_ref[...]     # (Nb, S)

    # --- softmax over the sequence axis (dim=1 in PyTorch) ---------------------
    scores = scores - jnp.max(scores, axis=-1, keepdims=True)
    p = jnp.exp(scores)
    denom = jnp.sum(p, axis=-1, keepdims=True)
    attn = p * pl.reciprocal(denom, approx=True)                  # (Nb, S)

    # --- attention-weighted pooling --------------------------------------------
    pooled = jnp.sum(attn[:, :, None] * x, axis=1)                # (Nb, D)

    pooled_ref[...] = pooled.astype(pooled_ref.dtype)
    attn_ref[...] = attn.astype(attn_ref.dtype)


def attention_pooling(x, w1, b1, w2, b2, *, block_b=None):
    """x: (B, S, D).  Weights are in PyTorch nn.Linear layout:
       w1: (D, D) [out, in], b1: (D,), w2: (1, D), b2: (1,)."""
    B, S, D = x.shape
    if block_b is None:
        # Biggest sublane-aligned batch tile that gives multiple grid steps
        # (>=2 parallel steps feeds both v7x TensorCores; DMA overlaps compute).
        block_b = 8 if (B % 8 == 0) else B
    assert B % block_b == 0

    w1t = w1.T                      # (in, out) so the kernel right-multiplies
    b1r = b1.reshape(1, D)
    w2r = w2.reshape(1, D)
    b2r = b2.reshape(1, 1)

    pooled, attn = pl.pallas_call(
        _attention_pooling_kernel,
        out_shape=(jax.ShapeDtypeStruct((B, D), x.dtype),
                   jax.ShapeDtypeStruct((B, S), x.dtype)),
        grid=(B // block_b,),
        in_specs=[
            pl.BlockSpec((block_b, S, D), lambda i: (i, 0, 0)),   # x
            pl.BlockSpec((D, D), lambda i: (0, 0)),               # W1^T
            pl.BlockSpec((1, D), lambda i: (0, 0)),               # b1
            pl.BlockSpec((1, D), lambda i: (0, 0)),               # W2 row
            pl.BlockSpec((1, 1), lambda i: (0, 0)),               # b2
        ],
        out_specs=(
            pl.BlockSpec((block_b, D), lambda i: (i, 0)),         # pooled
            pl.BlockSpec((block_b, S), lambda i: (i, 0)),         # attn weights
        ),
        compiler_params=pltpu.CompilerParams(
            dimension_semantics=("parallel",)),
    )(x, w1t, b1r, w2r, b2r)
    return pooled, attn


# ----------------------------------------------------------------------------
# Pure-JAX reference (mirrors the PyTorch module exactly)
# ----------------------------------------------------------------------------
def attention_pooling_ref(x, w1, b1, w2, b2):
    s = jnp.tanh(x @ w1.T + b1)
    s = (s @ w2.T + b2)[..., 0]
    a = jax.nn.softmax(s, axis=1)
    pooled = jnp.sum(x * a[..., None], axis=1)
    return pooled, a


# ----------------------------------------------------------------------------
if __name__ == "__main__":
    B, S, D = 32, 16, 32              # batch, sequence, hidden (input_dim)

    key = jax.random.PRNGKey(0)
    kx, k1, k2, k3, k4 = jax.random.split(key, 5)
    x = jax.random.normal(kx, (B, S, D), jnp.float32)

    bound = 1.0 / (D ** 0.5)          # PyTorch nn.Linear default init range
    w1 = jax.random.uniform(k1, (D, D), jnp.float32, -bound, bound)
    b1 = jax.random.uniform(k2, (D,), jnp.float32, -bound, bound)
    w2 = jax.random.uniform(k3, (1, D), jnp.float32, -bound, bound)
    b2 = jax.random.uniform(k4, (1,), jnp.float32, -bound, bound)

    pooled, attn = jax.block_until_ready(
        jax.jit(attention_pooling)(x, w1, b1, w2, b2))

    assert pooled.shape == (B, D) and attn.shape == (B, S)

    pooled_ref, attn_ref = attention_pooling_ref(x, w1, b1, w2, b2)
    # Loose tolerance covers bf16 MXU operands + approx reciprocal in softmax.
    np.testing.assert_allclose(np.asarray(pooled), np.asarray(pooled_ref),
                               atol=3e-2, rtol=3e-2)
    np.testing.assert_allclose(np.asarray(attn), np.asarray(attn_ref),
                               atol=3e-2, rtol=3e-2)
    print("KERNEL_OK")
</pallas_src>

<mosaic_0001>
module attributes {stable_mosaic.version = 11 : i64} {
  func.func @_attention_pooling_kernel(%arg0: i32, %arg1: memref<8x16x32xf32, #tpu.memory_space<vmem>>, %arg2: memref<32x32xf32, #tpu.memory_space<vmem>>, %arg3: memref<1x32xf32, #tpu.memory_space<vmem>>, %arg4: memref<1x32xf32, #tpu.memory_space<vmem>>, %arg5: memref<1x1xf32, #tpu.memory_space<vmem>>, %arg6: memref<8x32xf32, #tpu.memory_space<vmem>>, %arg7: memref<8x16xf32, #tpu.memory_space<vmem>>) attributes {dimension_semantics = [#tpu.dimension_semantics<parallel>], iteration_bounds = array<i64: 4>, scalar_prefetch = 0 : i64, scratch_operands = 0 : i64, tpu.core_type = #tpu.core_type<tc>, window_params = [{transform_indices = @transform_0, window_bounds = array<i64: 8, 16, 32>}, {pipeline_mode = #tpu.pipeline_mode<synchronous>, transform_indices = @transform_1, window_bounds = array<i64: 32, 32>}, {pipeline_mode = #tpu.pipeline_mode<synchronous>, transform_indices = @transform_2, window_bounds = array<i64: 1, 32>}, {pipeline_mode = #tpu.pipeline_mode<synchronous>, transform_indices = @transform_3, window_bounds = array<i64: 1, 32>}, {pipeline_mode = #tpu.pipeline_mode<synchronous>, transform_indices = @transform_4, window_bounds = array<i64: 1, 1>}, {transform_indices = @transform_5, window_bounds = array<i64: 8, 32>}, {transform_indices = @transform_6, window_bounds = array<i64: 8, 16>}]} {
    %c0 = arith.constant 0 : index
    %c0_0 = arith.constant 0 : index
    %c0_1 = arith.constant 0 : index
    %0 = vector.load %arg1[%c0, %c0_0, %c0_1] : memref<8x16x32xf32, #tpu.memory_space<vmem>>, vector<8x16x32xf32>
    %1 = vector.shape_cast %0 : vector<8x16x32xf32> to vector<128x32xf32>
    %2 = arith.truncf %1 : vector<128x32xf32> to vector<128x32xbf16>
    %c0_2 = arith.constant 0 : index
    %c0_3 = arith.constant 0 : index
    %3 = vector.load %arg2[%c0_2, %c0_3] : memref<32x32xf32, #tpu.memory_space<vmem>>, vector<32x32xf32>
    %4 = arith.truncf %3 : vector<32x32xf32> to vector<32x32xbf16>
    %cst = arith.constant dense<0.000000e+00> : vector<128x32xf32>
    %5 = tpu.matmul %2, %4, %cst {dimension_numbers = #tpu.dot_dimension_numbers<[1], [0], [0], [1], [0, 0, 1, 1], [], []>} : vector<128x32xbf16>, vector<32x32xbf16>, vector<128x32xf32> -> vector<128x32xf32>
    %c0_4 = arith.constant 0 : index
    %c0_5 = arith.constant 0 : index
    %6 = vector.load %arg3[%c0_4, %c0_5] : memref<1x32xf32, #tpu.memory_space<vmem>>, vector<1x32xf32>
    %7 = vector.broadcast %6 : vector<1x32xf32> to vector<128x32xf32>
    %8 = arith.addf %5, %7 : vector<128x32xf32>
    %9 = math.tanh %8 : vector<128x32xf32>
    %10 = vector.shape_cast %9 : vector<128x32xf32> to vector<8x16x32xf32>
    %c0_6 = arith.constant 0 : index
    %c0_7 = arith.constant 0 : index
    %11 = vector.load %arg4[%c0_6, %c0_7] : memref<1x32xf32, #tpu.memory_space<vmem>>, vector<1x32xf32>
    %12 = vector.shape_cast %11 : vector<1x32xf32> to vector<1x1x32xf32>
    %13 = vector.broadcast %12 : vector<1x1x32xf32> to vector<8x16x32xf32>
    %14 = arith.mulf %10, %13 : vector<8x16x32xf32>
    %cst_8 = arith.constant dense<0.000000e+00> : vector<8x16xf32>
    %15 = vector.multi_reduction <add>, %14, %cst_8 [2] : vector<8x16x32xf32> to vector<8x16xf32>
    %c0_9 = arith.constant 0 : index
    %c0_10 = arith.constant 0 : index
    %16 = vector.load %arg5[%c0_9, %c0_10] : memref<1x1xf32, #tpu.memory_space<vmem>>, vector<1x1xf32>
    %17 = vector.broadcast %16 : vector<1x1xf32> to vector<8x16xf32>
    %18 = arith.addf %15, %17 : vector<8x16xf32>
    %cst_11 = arith.constant dense<0xFF800000> : vector<8xf32>
    %19 = vector.multi_reduction <maximumf>, %18, %cst_11 [1] : vector<8x16xf32> to vector<8xf32>
    %20 = vector.shape_cast %19 : vector<8xf32> to vector<8x1xf32>
    %21 = vector.broadcast %20 : vector<8x1xf32> to vector<8x16xf32>
    %22 = arith.subf %18, %21 : vector<8x16xf32>
    %23 = math.exp %22 : vector<8x16xf32>
    %cst_12 = arith.constant dense<0.000000e+00> : vector<8xf32>
    %24 = vector.multi_reduction <add>, %23, %cst_12 [1] : vector<8x16xf32> to vector<8xf32>
    %25 = vector.shape_cast %24 : vector<8xf32> to vector<8x1xf32>
    %26 = tpu.reciprocal %25 {approx = true} : vector<8x1xf32> -> vector<8x1xf32>
    %27 = vector.broadcast %26 : vector<8x1xf32> to vector<8x16xf32>
    %28 = arith.mulf %23, %27 : vector<8x16xf32>
    %29 = vector.shape_cast %28 : vector<8x16xf32> to vector<8x16x1xf32>
    %30 = vector.broadcast %29 : vector<8x16x1xf32> to vector<8x16x32xf32>
    %31 = arith.mulf %30, %0 : vector<8x16x32xf32>
    %cst_13 = arith.constant dense<0.000000e+00> : vector<8x32xf32>
    %32 = vector.multi_reduction <add>, %31, %cst_13 [1] : vector<8x16x32xf32> to vector<8x32xf32>
    %c0_14 = arith.constant 0 : index
    %c0_15 = arith.constant 0 : index
    %33 = vector.load %arg6[%c0_14, %c0_15] : memref<8x32xf32, #tpu.memory_space<vmem>>, vector<8x32xf32>
    tpu.vector_store %arg6[%c0_14, %c0_15], %32 {strides = array<i32>} : memref<8x32xf32, #tpu.memory_space<vmem>>, vector<8x32xf32>,
    %c0_16 = arith.constant 0 : index
    %c0_17 = arith.constant 0 : index
    %34 = vector.load %arg7[%c0_16, %c0_17] : memref<8x16xf32, #tpu.memory_space<vmem>>, vector<8x16xf32>
    tpu.vector_store %arg7[%c0_16, %c0_17], %28 {strides = array<i32>} : memref<8x16xf32, #tpu.memory_space<vmem>>, vector<8x16xf32>,
    return
  }
  func.func @transform_0(%arg0: i32) -> (i32, i32, i32) {
    %c0_i32 = arith.constant 0 : i32
    %c0_i32_0 = arith.constant 0 : i32
    %c0_i32_1 = arith.constant 0 : i32
    return %arg0, %c0_i32, %c0_i32_0 : i32, i32, i32
  }
  func.func @transform_1(%arg0: i32) -> (i32, i32) {
    %c0_i32 = arith.constant 0 : i32
    %c0_i32_0 = arith.constant 0 : i32
    %c0_i32_1 = arith.constant 0 : i32
    return %c0_i32, %c0_i32_0 : i32, i32
  }
  func.func @transform_2(%arg0: i32) -> (i32, i32) {
    %c0_i32 = arith.constant 0 : i32
    %c0_i32_0 = arith.constant 0 : i32
    %c0_i32_1 = arith.constant 0 : i32
    return %c0_i32, %c0_i32_0 : i32, i32
  }
  func.func @transform_3(%arg0: i32) -> (i32, i32) {
    %c0_i32 = arith.constant 0 : i32
    %c0_i32_0 = arith.constant 0 : i32
    %c0_i32_1 = arith.constant 0 : i32
    return %c0_i32, %c0_i32_0 : i32, i32
  }
  func.func @transform_4(%arg0: i32) -> (i32, i32) {
    %c0_i32 = arith.constant 0 : i32
    %c0_i32_0 = arith.constant 0 : i32
    %c0_i32_1 = arith.constant 0 : i32
    return %c0_i32, %c0_i32_0 : i32, i32
  }
  func.func @transform_5(%arg0: i32) -> (i32, i32) {
    %c0_i32 = arith.constant 0 : i32
    %c0_i32_0 = arith.constant 0 : i32
    return %arg0, %c0_i32 : i32, i32
  }
  func.func @transform_6(%arg0: i32) -> (i32, i32) {
    %c0_i32 = arith.constant 0 : i32
    %c0_i32_0 = arith.constant 0 : i32
    return %arg0, %c0_i32 : i32, i32
  }
}

</mosaic_0001>

<bundles_post_ra>
// kernel: attention_pooling.1
= control target key start
LH: loop header
LB: loop body
LE: loop exit
PB: predicated region body
PF: predicated region fallthrough
CT: control target
= control target key end

     0   :  { %s2318_s0 = inlined_call_operand.hbm [shape: f32[32,16,32], index: 0, kind: input, shape index: {}]   ;;  %s2319_s1 = inlined_call_operand.vmem [shape: f32[32,32], index: 1, kind: input, shape index: {}]   ;;  %s2320_s2 = inlined_call_operand.vmem [shape: f32[1,32], index: 2, kind: input, shape index: {}]   ;;  %s2321_s3 = inlined_call_operand.vmem [shape: f32[1,32], index: 3, kind: input, shape index: {}]   ;;  %s2322_s4 = inlined_call_operand.<no memory space> [shape: f32[1,1], index: 4, kind: input, shape index: {}]   ;;  %s2323_s5 = inlined_call_operand.hbm [shape: f32[32,32], index: 5, kind: output, shape index: {0}]   ;;  %s2324_s6 = inlined_call_operand.vmem [shape: f32[32,16], index: 6, kind: output, shape index: {1}]  }
   0x1   :  { %v12_v0 = vstv %s2322_s4 }
   0x2   :  { %13 = vst [vmem:[#allocation2] sm:$0x1] %v12_v0 }
   0x3   :  { %14 = vsyncpa [#allocation4], 0 }
   0x4   :  { %16 = vsyncpa [#allocation4 + $0x1], 0 }
   0x5   :  { %17 = vsyncpa [#allocation5], 0 }
   0x6   :  { %19 = vsyncpa [#allocation5 + $0x1], 0  ;;  %s1660_s23 = smov 0   ;;  %s1662_s24 = smov 0  }
   0x7   :  { %s1664_s25 = smov 0   ;;  %s1666_s26 = smov 0  }
   0x8 LB: > { %s1681_s4 = sadd.s32 4294967295, %s1615_s26   ;;  %s1344_s27 = sadd.s32 4294967294, %s1615_s26   ;;  %s1615_s26 = sphi %s1666_s26, %s2344_s26   ;;  %s1611_s25 = sphi %s1664_s25, %s2343_s25   ;;  %s1607_s24 = sphi %s1662_s24, %s2342_s24   ;;  %s1603_s23 = sphi %s1660_s23, %s2341_s23  }
   0x9   : > { %s1685_s28 = sadd.s32 1, %s1615_s26   ;;  %s32_s29 = sadd.s32 1, %s1611_s25 }
   0xa   : > { %s29_s30 = ssub.s32 %s1615_s26, %s1685_s28  ;;  %p39_p0 = scmp.ne.s32.totalorder %s1611_s25, %s1607_s24 }
   0xb   : > { %p30_p1 = scmp.eq.s32.totalorder %s29_s30, 0  ;;  %p40_p2 = scmp.eq.s32.totalorder %s1615_s26, 0 }
   0xc   : > { %p45_p3 = scmp.ne.s32.totalorder %s1607_s24, %s1603_s23  ;;  %p46_p4 = scmp.eq.s32.totalorder %s1681_s4, 0 }
   0xd   : > { %s1697_s7 = scalar_select %p30_p1, %s1611_s25, %s32_s29  }
   0xe   : > { %p1699_p5 = por %p40_p2, %p39_p0  ;;  %p1703_p6 = por %p46_p4, %p45_p3 }
   0xf   : > { %p153_p7 = scmp.eq.s32.totalorder %s1681_s4, 3  ;;  %p159_p8 = scmp.eq.s32.totalorder %s1344_s27, 3 }
  0x10   : > { %s2331_s9 = scalar_select %p1703_p6, 1, 0 }
  0x11   : > { %p1418_p9 = scmp.lt.s32.totalorder %s1615_s26, 4  ;;  %p1709_p10 = por %p153_p7, %p39_p0 }
  0x12   : > { %p1713_p11 = por %p159_p8, %p45_p3  ;;  %s217_s12 = sand.u32 1, %s1611_s25  }
  0x13   : > { %s2332_s10 = scalar_select %p1709_p10, 1, 0 }
  0x14   : > { %s2333_s11 = scalar_select %p1713_p11, 1, 0 }
  0x15   : > { %s1371_s13 = sshll.u32 %s1615_s26, 11  ;;  %s1347_s14 = sshll.u32 %s217_s12, 7 }
  0x16   : > { %s1722_s17 = scalar_lea.hbm %s2318_s0, %s1371_s13  ;;  %s221_s18 = scalar_lea.vmem [#allocation3], %s1347_s14 }
  0x17   : > { %s229_s19 = sshll.u32 %s221_s18, 4  ;;  %p1726_p12 = pnand %p1418_p9, %p1699_p5  ;;  %s1730_s19 = int_to_ptr.vmem [resolvable:$true] %s229_s19 }
  0x18   : > { %s1732_s21 = scalar_lea.sflag [#allocation4], %s217_s12  ;;  %s1523_s22 = scalar_lea.hbm %s1722_s17, 2048 }
  0x19   : > { %p1524_p13 = scmp.ne.s32.totalorder %s1722_s17, %s1523_s22  ;;  %p1525_p0 = pneg %p1726_p12 }
  0x1a   : > { %s1528_s30 = scalar_lea.hbm %s2318_s0, 8192  ;;  %p1529_p3 = scmp.lt.s32.totalorder %s1722_s17, %s2318_s0 }
  0x1b   : > { %p1526_p1 = pnand %p1525_p0, %p1524_p13  ;;  %p1530_p4 = scmp.lt.s32.totalorder %s1528_s30, %s1523_s22 }
  0x1d   : > { %p1527_p2 = pneg %p1526_p1  ;;  %p1531_p5 = por %p1530_p4, %p1529_p3 }
  0x1f   : > { %p1532_p7 = pnand %p1531_p5, %p1527_p2 }
  0x21   : > { %1535 = shalt.err (!%p1532_p7)
}
  0x22   : > { %s1536_s12 = scalar_lea.vmem %s1730_s19, 2048  ;;  %s1617_s14 = smov [#allocation3]  }
  0x23   : > { %p1537_p8 = scmp.ne.s32.totalorder %s1730_s19, %s1536_s12  ;;  %s1541_s15 = sshll.u32 %s1617_s14, 4  ;;  %s1542_s15 = int_to_ptr.vmem [resolvable:$false] %s1541_s15 }
  0x24   : > { %s1543_s16 = scalar_lea.vmem %s1542_s15, 4096  ;;  %p1544_p1 = scmp.lt.s32.totalorder %s1730_s19, %s1542_s15 }
  0x25   : > { %p1539_p9 = pnand %p1537_p8, %p1525_p0  ;;  %p1545_p11 = scmp.lt.s32.totalorder %s1543_s16, %s1536_s12 }
  0x27   : > { %p1540_p13 = pneg %p1539_p9  ;;  %p1546_p10 = por %p1545_p11, %p1544_p1 }
  0x29   : > { %p1547_p6 = pnand %p1546_p10, %p1540_p13 }
  0x2b   : > { %1550 = shalt.err (!%p1547_p6)
}
  0x2c   : > { %s1618_s18 = smov 128   ;;  %s1619_s22 = smov 8  }
  0x2d   : > { %1413 = dma.hbm_to_vmem [thread:$0]  (!%p1726_p12), %s1722_s17, 2048, %s1730_s19, %s1732_s21, %s1618_s18, %s1618_s18, %s1619_s22  }
  0x2e   : > { %p1351_p0 = scmp.ge.s32.totalorder %s1615_s26, 1  ;;  %p237_p2 = scmp.lt.s32.totalorder %s1615_s26, 5 }
  0x30   : > { %p238_p3 = pnand %p1351_p0, %p237_p2 }
  0x31   : > { %s1756_s27 = sand.u32 (!%p238_p3), 1, %s1607_s24   ;;  %p2335_p6 = scmp.ne.s32.totalorder (!%p238_p3), %s2331_s9, 0 }
  0x32   : > { %241 = sbr.rel (%p238_p3) target bundleno = 1160 (0x488), region = 40  ;;  %s1352_s29 = sshll.u32 (!%p238_p3), %s1756_s27, 7 }
  0x33   : > { %s244_s30 = scalar_lea.sflag (!%p238_p3), [#allocation4], %s1756_s27  ;;  %s1760_s8 = scalar_lea.vmem (!%p238_p3), [#allocation3], %s1352_s29 }
  0x37   : > { %1594 = dma.done.wait (%p2335_p6), %s244_s30, 2048  }
  0x38   : > { %1596 = vsyncadd (%p2335_p6), %s244_s30, 4294965248  ;;  %v312_v1 = vld [vmem:[%s2319_s1 + $0x10] sm:$0xff]  ;;  %v313_v2 = vld [vmem:[%s2319_s1 + $0x18] sm:$0xff]  ;;  %vm323_vm0 = vcmask 261120   ;;  %v1620_v31 = vmov 0   ;;  %vm585_vm1 = vcmask 130112  }
  0x39   : > { %v310_v3 = vld [vmem:[%s2319_s1] sm:$0xff]  ;;  %v315_v4 = vpack.c.bf16 %v313_v2, %v312_v1  ;;  %v311_v5 = vld [vmem:[%s2319_s1 + $0x8] sm:$0xff]  ;;  %v1795_v13 = vld [vmem:[%s1760_s8 + $0x10] sm:$0xff]  ;;  %1455 = vset.pattern.permute.xlu0 %v1620_v31  ;;  %1456 = vset.pattern.permute.xlu1 %v1620_v31  ;;  %vm650_vm2 = vcmask 1041409   ;;  %vm652_vm3 = vcmask 1042434   ;;  %vm654_vm4 = vcmask 1043459  }
  0x3a   : > { %v1779_v6 = vld [vmem:[%s1760_s8] sm:$0xff]  ;;  %v1782_v7 = vld [vmem:[%s1760_s8 + $0x8] sm:$0xff]  ;;  %v314_v8 = vpack.c.bf16 %v311_v5, %v310_v3  ;;  %v1798_v14 = vld [vmem:[%s1760_s8 + $0x18] sm:$0xff]  ;;  %vm656_vm5 = vcmask 1044484   ;;  %vm658_vm6 = vcmask 1045509   ;;  %vm660_vm7 = vcmask 1046534  }
  0x3b   : > { %v302_v9 = vpack.c.bf16 %v1782_v7, %v1779_v6  ;;  %v1787_v10 = vld [vmem:[%s1760_s8 + $0x40] sm:$0xff]  ;;  %v1790_v11 = vld [vmem:[%s1760_s8 + $0x48] sm:$0xff]  ;;  %1382 = vmatprep.subr.bf16.mxu0 %v315_v4  ;;  %1402 = vmatprep.subr.bf16.mxu1 %v315_v4  ;;  %v1801_v15 = vld [vmem:[%s1760_s8 + $0x50] sm:$0xff]  ;;  %v303_v21 = vpack.c.bf16 %v1798_v14, %v1795_v13  ;;  %vm662_vm8 = vcmask 1047559   ;;  %vm665_vm9 = vcmask 130048   ;;  %p281_p10 = scmp.lt.s32.totalorder %s1681_s4, 3 }
  0x3c   : > { %v306_v12 = vpack.c.bf16 %v1790_v11, %v1787_v10  ;;  %1383 = vmatpush3.bf16.msra.mxu0 %v315_v4  ;;  %1404 = vmatpush3.bf16.msra.mxu1 %v315_v4  ;;  %v1804_v16 = vld [vmem:[%s1760_s8 + $0x58] sm:$0xff]  ;;  %v1807_v17 = vld [vmem:[%s1760_s8 + $0x20] sm:$0xff]  ;;  %v1810_v18 = vld [vmem:[%s1760_s8 + $0x28] sm:$0xff]  ;;  %s1353_s20 = sshll.u32 %s1756_s27, 3  ;;  %s1367_s21 = sshll.u32 %s1681_s4, 7 }
  0x3d   : > { %1384 = vmatprep.subr.bf16.mxu0 %v314_v8  ;;  %1403 = vmatprep.subr.bf16.mxu1 %v314_v8  ;;  %v1813_v19 = vld [vmem:[%s1760_s8 + $0x60] sm:$0xff]  ;;  %v1816_v20 = vld [vmem:[%s1760_s8 + $0x68] sm:$0xff]  ;;  %v307_v22 = vpack.c.bf16 %v1804_v16, %v1801_v15  ;;  %v304_v23 = vpack.c.bf16 %v1810_v18, %v1807_v17  ;;  %v1831_v25 = vld [vmem:[%s1760_s8 + $0x30] sm:$0xff]  ;;  %s2238_s29 = scalar_select %p281_p10, %s1681_s4, 3 }
  0x3e   : > { %1386 = vmatprep.mubr.msk.bf16.mxu0 %vm323_vm0, %v302_v9  ;;  %1394 = vmatprep.mubr.msk.bf16.mxu1 %vm323_vm0, %v306_v12  ;;  %v308_v24 = vpack.c.bf16 %v1816_v20, %v1813_v19  ;;  %v1835_v26 = vld [vmem:[%s1760_s8 + $0x38] sm:$0xff]  ;;  %v1839_v27 = vld [vmem:[%s1760_s8 + $0x70] sm:$0xff]  ;;  %s273_s13 = scalar_lea.vmem [#allocation6], %s1353_s20  ;;  %s2280_s15 = scalar_lea.hbm %s2323_s5, %s1367_s21 }
  0x3f   : > { %v1842_v28 = vld [vmem:[%s1760_s8 + $0x78] sm:$0xff]  ;;  %v305_v29 = vpack.c.bf16 %v1835_v26, %v1831_v25  ;;  %s1354_s30 = sshll.u32 %s2238_s29, 3  ;;  %s1247_s12 = sshll.u32 %s273_s13, 4  ;;  %s1248_s12 = int_to_ptr.vmem [resolvable:$true] %s1247_s12 }
  0x40   : > { %1385 = vmatpush3.bf16.msra.mxu0 %v314_v8  ;;  %1405 = vmatpush3.bf16.msra.mxu1 %v314_v8  ;;  %v309_v30 = vpack.c.bf16 %v1842_v28, %v1839_v27  ;;  %v1853_v32 = vld [vmem:[%s2320_s2] ss:$0 sm:$0xff]  ;;  %s284_s19 = scalar_lea.vmem %s2324_s6, %s1354_s30  ;;  %s1230_s4 = scalar_lea.sflag [#allocation5], %s1756_s27 }
  0x41   : > { %v1869_v59 = vld [vmem:[%s2321_s3] ss:$0 sm:$0xff]  ;;  %s1551_s16 = scalar_lea.vmem %s1248_s12, 128  ;;  %p2339_p12 = scmp.ne.s32.totalorder %s2332_s10, 0 }
  0x42   : > { %p1552_p11 = scmp.ne.s32.totalorder %s1248_s12, %s1551_s16  ;;  %s1621_s18 = smov [#allocation6]  }
  0x43   : > { %1387 = vmatmul.mubr.msk.bf16.vlgmr.msra.gmra.mxu0 %vm323_vm0, %v303_v21  ;;  %1395 = vmatmul.mubr.msk.bf16.vlgmr.msra.gmra.mxu1 %vm323_vm0, %v307_v22  ;;  %s1555_s22 = sshll.u32 %s1621_s18, 4  ;;  %s1556_s22 = int_to_ptr.vmem [resolvable:$false] %s1555_s22 }
  0x44   : > { %1390 = vmatprep.mubr.msk.bf16.mxu0 %vm323_vm0, %v304_v23  ;;  %1398 = vmatprep.mubr.msk.bf16.mxu1 %vm323_vm0, %v308_v24  ;;  %p1553_p4 = pnand %p1552_p11, %p2339_p12  ;;  %s1557_s29 = scalar_lea.vmem %s1556_s22, 256 }
  0x45   : > { %p1558_p7 = scmp.lt.s32.totalorder %s1248_s12, %s1556_s22  ;;  %p1559_p8 = scmp.lt.s32.totalorder %s1557_s29, %s1551_s16 }
  0x46   : > { %p1554_p5 = pneg %p1553_p4 }
  0x47   : > { %p1560_p9 = por %p1559_p8, %p1558_p7 }
  0x49   : > { %p1561_p13 = pnand %p1560_p9, %p1554_p5 }
  0x4b   : > { %1391 = vmatmul.mubr.msk.bf16.gmra.mxu0 %vm323_vm0, %v305_v29  ;;  %1399 = vmatmul.mubr.msk.bf16.gmra.mxu1 %vm323_vm0, %v309_v30 }
 0x103   : > { %v1388_v33 = vpop.f32.mrf.mxu0  ;;  %v1396_v34 = vpop.f32.mrf.mxu1 }
 0x104   : > { %v391_v35 = vadd.f32 %v1388_v33, %v1853_v32  ;;  %v423_v36 = vadd.f32 %v1396_v34, %v1853_v32 }
 0x105   : > { %v382_v37 = vpop.f32.mrf.mxu0  ;;  %v414_v38 = vpop.f32.mrf.mxu1 }
 0x106   : > { %1457 = vtanh.f32 %v391_v35  ;;  %v383_v39 = vadd.f32 %v1853_v32, %v382_v37  ;;  %v415_v40 = vadd.f32 %v1853_v32, %v414_v38 }
 0x107   : > { %1459 = vtanh.f32 %v423_v36  ;;  %v1389_v41 = vpop.f32.mrf.mxu0  ;;  %v1397_v42 = vpop.f32.mrf.mxu1 }
 0x108   : > { %1461 = vtanh.f32 %v383_v39  ;;  %v394_v43 = vadd.f32 %v1389_v41, %v1853_v32  ;;  %v426_v44 = vadd.f32 %v1397_v42, %v1853_v32 }
 0x109   : > { %1463 = vtanh.f32 %v415_v40  ;;  %v385_v45 = vpop.f32.mrf.mxu0  ;;  %v417_v46 = vpop.f32.mrf.mxu1 }
 0x10a   : > { %1465 = vtanh.f32 %v394_v43  ;;  %v418_v47 = vadd.f32 %v1853_v32, %v417_v46  ;;  %v386_v48 = vadd.f32 %v1853_v32, %v385_v45 }
 0x10b   : > { %1467 = vtanh.f32 %v426_v44  ;;  %v1392_v49 = vpop.f32.mrf.mxu0  ;;  %v1400_v50 = vpop.f32.mrf.mxu1 }
 0x10c   : > { %v407_v51 = vadd.f32 %v1392_v49, %v1853_v32  ;;  %1469 = vtanh.f32 %v418_v47  ;;  %v439_v57 = vadd.f32 %v1400_v50, %v1853_v32 }
 0x10d   : > { %v398_v52 = vpop.f32.mrf.mxu0  ;;  %v430_v53 = vpop.f32.mrf.mxu1  ;;  %1471 = vtanh.f32 %v386_v48 }
 0x10e   : > { %1473 = vtanh.f32 %v407_v51  ;;  %v399_v9 = vadd.f32 %v1853_v32, %v398_v52  ;;  %v431_v33 = vadd.f32 %v1853_v32, %v430_v53 }
 0x10f   : > { %v1393_v54 = vpop.f32.mrf.mxu0  ;;  %v1401_v55 = vpop.f32.mrf.mxu1 }
 0x110   : > { %v410_v56 = vadd.f32 %v1393_v54, %v1853_v32  ;;  %v442_v24 = vadd.f32 %v1401_v55, %v1853_v32 }
 0x111   : > { %v401_v58 = vpop.f32.mrf.mxu0  ;;  %v433_v62 = vpop.f32.mrf.mxu1 }
 0x112   : > { %1475 = vtanh.f32 %v410_v56  ;;  %v402_v60 = vadd.f32 %v1853_v32, %v401_v58  ;;  %v434_v4 = vadd.f32 %v1853_v32, %v433_v62 }
 0x113   : > { %v1458_v61 = vpop.eup %1457  ;;  %1477 = vtanh.f32 %v439_v57 }
 0x114   : > { %v1460_v63 = vpop.eup %1459  ;;  %v470_v0 = vmul.f32 %v1458_v61, %v1869_v59  ;;  %1479 = vtanh.f32 %v402_v60 }
 0x115   : > { %v1462_v1 = vpop.eup %1461  ;;  %v478_v2 = vmul.f32 %v1460_v63, %v1869_v59  ;;  %1481 = vtanh.f32 %v434_v4 }
 0x116   : > { %v1464_v3 = vpop.eup %1463  ;;  %v490_v5 = vsel %vm323_vm0, %v470_v0, 0.0  ;;  %v468_v21 = vmul.f32 %v1462_v1, %v1869_v59  ;;  %1483 = vtanh.f32 %v399_v9 }
 0x117   : > { %v1466_v8 = vpop.eup %1465  ;;  %v514_v12 = vsel %vm323_vm0, %v478_v2, 0.0  ;;  %491 = vadd.xlane.f32.xlu1 %v490_v5  ;;  %v476_v35 = vmul.f32 %v1464_v3, %v1869_v59  ;;  %1485 = vtanh.f32 %v442_v24  ;;  %v1365_v3 = vld [vmem:[#allocation2] ss:$0 sm:$0xff] }
 0x118   : > { %v1468_v22 = vpop.eup %1467  ;;  %515 = vadd.xlane.f32.xlu0 %v514_v12  ;;  %v471_v23 = vmul.f32 %v1466_v8, %v1869_v59  ;;  %v484_v34 = vsel %vm323_vm0, %v468_v21, 0.0  ;;  %1487 = vtanh.f32 %v431_v33 }
 0x119   : > { %v479_v30 = vmul.f32 %v1468_v22, %v1869_v59  ;;  %v1470_v31 = vpop.eup %1469  ;;  %v508_v41 = vsel %vm323_vm0, %v476_v35, 0.0 }
 0x11a   : > { %v493_v29 = vsel %vm323_vm0, %v471_v23, 0.0  ;;  %v1472_v36 = vpop.eup %1471  ;;  %v477_v39 = vmul.f32 %v1470_v31, %v1869_v59 }
 0x11b   : > { %494 = vadd.xlane.f32.xlu1 %v493_v29  ;;  %v1474_v37 = vpop.eup %1473  ;;  %v517_v38 = vsel %vm323_vm0, %v479_v30, 0.0  ;;  %v469_v32 = vmul.f32 %v1472_v36, %v1869_v59  ;;  %v574_v30 = vlaneseq }
 0x11c   : > { %485 = vadd.xlane.f32.xlu0 %v484_v34  ;;  %v474_v43 = vmul.f32 %v1474_v37, %v1869_v59  ;;  %v511_v45 = vsel %vm323_vm0, %v477_v39, 0.0 }
 0x11d   : > { %v487_v47 = vsel %vm323_vm0, %v469_v32, 0.0  ;;  %v575_v33 = vand.u32 127, %v574_v30  ;;  %v1908_v36 = vshrl.u32 %v574_v30, 7 }
 0x11e   : > { %v502_v49 = vsel %vm323_vm0, %v474_v43, 0.0 }
 0x11f   : > { %v1476_v40 = vpop.eup %1475  ;;  %518 = vadd.xlane.f32.xlu1 %v517_v38  ;;  %v580_v37 = vadd.s32 4294967288, %v575_v33 }
 0x120   : > { %509 = vadd.xlane.f32.xlu0 %v508_v41  ;;  %v475_v42 = vmul.f32 %v1476_v40, %v1869_v59  ;;  %v1478_v44 = vpop.eup %1477  ;;  %v1911_v40 = vsub.s32 %v575_v33, %v1908_v36 }
 0x121   : > { %v1480_v46 = vpop.eup %1479  ;;  %v482_v50 = vmul.f32 %v1478_v44, %v1869_v59  ;;  %v1914_v41 = vsub.s32 %v580_v37, %v1908_v36 }
 0x122   : > { %v505_v48 = vsel %vm323_vm0, %v475_v42, 0.0  ;;  %v473_v51 = vmul.f32 %v1480_v46, %v1869_v59  ;;  %v1482_v52 = vpop.eup %1481 }
 0x123   : > { %512 = vadd.xlane.f32.xlu1 %v511_v45  ;;  %v1484_v53 = vpop.eup %1483  ;;  %v526_v54 = vsel %vm323_vm0, %v482_v50, 0.0  ;;  %v481_v56 = vmul.f32 %v1482_v52, %v1869_v59 }
 0x124   : > { %488 = vadd.xlane.f32.xlu0 %v487_v47  ;;  %v499_v55 = vsel %vm323_vm0, %v473_v51, 0.0  ;;  %v1486_v57 = vpop.eup %1485  ;;  %v472_v58 = vmul.f32 %v1484_v53, %v1869_v59 }
 0x125   : > { %v1488_v60 = vpop.eup %1487  ;;  %v523_v61 = vsel %vm323_vm0, %v481_v56, 0.0  ;;  %v483_v62 = vmul.f32 %v1486_v57, %v1869_v59 }
 0x126   : > { %v496_v63 = vsel %vm323_vm0, %v472_v58, 0.0  ;;  %v480_v0 = vmul.f32 %v1488_v60, %v1869_v59 }
 0x127   : > { %506 = vadd.xlane.f32.xlu1 %v505_v48  ;;  %v529_v1 = vsel %vm323_vm0, %v483_v62, 0.0 }
 0x128   : > { %503 = vadd.xlane.f32.xlu0 %v502_v49  ;;  %v520_v2 = vsel %vm323_vm0, %v480_v0, 0.0 }
 0x12b   : > { %500 = vadd.xlane.f32.xlu1 %v499_v55 }
 0x12c   : > { %527 = vadd.xlane.f32.xlu0 %v526_v54 }
 0x12f   : > { %524 = vadd.xlane.f32.xlu1 %v523_v61 }
 0x130   : > { %497 = vadd.xlane.f32.xlu0 %v496_v63 }
 0x133   : > { %530 = vadd.xlane.f32.xlu1 %v529_v1 }
 0x134   : > { %521 = vadd.xlane.f32.xlu0 %v520_v2 }
 0x14a   : > { %539 = vperm.xlu0 %1455, %v1365_v3  }
 0x1a0   : > { %v492_v4 = vpop.xlane.xlu1 %491 }
 0x1a1   : > { %v516_v5 = vpop.xlane.xlu0 %515 }
 0x1a4   : > { %v495_v9 = vpop.xlane.xlu1 %494 }
 0x1a5   : > { %v486_v8 = vpop.xlane.xlu0 %485 }
 0x1a8   : > { %v519_v21 = vpop.xlane.xlu1 %518 }
 0x1a9   : > { %v510_v12 = vpop.xlane.xlu0 %509 }
 0x1ac   : > { %v513_v24 = vpop.xlane.xlu1 %512 }
 0x1ad   : > { %v489_v22 = vpop.xlane.xlu0 %488 }
 0x1b0   : > { %v507_v59 = vpop.xlane.xlu1 %506 }
 0x1b1   : > { %v504_v23 = vpop.xlane.xlu0 %503 }
 0x1b4   : > { %v501_v34 = vpop.xlane.xlu1 %500 }
 0x1b5   : > { %v528_v29 = vpop.xlane.xlu0 %527 }
 0x1b8   : > { %v525_v38 = vpop.xlane.xlu1 %524 }
 0x1b9   : > { %v498_v31 = vpop.xlane.xlu0 %497 }
 0x1bc   : > { %v531_v55 = vpop.xlane.xlu1 %530 }
 0x1bd   : > { %v522_v35 = vpop.xlane.xlu0 %521 }
 0x1c5   : > { %v540_v39 = vpop.permute.xlu0 %539 }
 0x1c6   : > { %v1916_v32 = vadd.f32 %v540_v39, %v486_v8  ;;  %v1918_v42 = vadd.f32 %v540_v39, %v489_v22  ;;  %v1920_v43 = vadd.f32 %v540_v39, %v492_v4  ;;  %v1922_v44 = vadd.f32 %v540_v39, %v495_v9 }
 0x1c7   : > { %v1924_v45 = vadd.f32 %v540_v39, %v498_v31  ;;  %v1926_v46 = vadd.f32 %v540_v39, %v501_v34  ;;  %v1928_v47 = vadd.f32 %v540_v39, %v504_v23  ;;  %v1930_v48 = vadd.f32 %v540_v39, %v507_v59 }
 0x1c8   : > { %v1932_v49 = vadd.f32 %v540_v39, %v510_v12  ;;  %v1934_v50 = vadd.f32 %v540_v39, %v513_v24  ;;  %v1936_v51 = vadd.f32 %v540_v39, %v516_v5  ;;  %v1938_v52 = vadd.f32 %v540_v39, %v519_v21 }
 0x1c9   : > { %v1940_v53 = vadd.f32 %v540_v39, %v522_v35  ;;  %v1942_v54 = vadd.f32 %v540_v39, %v525_v38  ;;  %v579_v56 = vrot.slane %v1916_v32, %v1911_v40  ;;  %v584_v57 = vrot.slane %v1918_v42, %v1914_v41 }
 0x1ca   : > { %v590_v58 = vrot.slane %v1920_v43, %v1911_v40  ;;  %v594_v60 = vrot.slane %v1922_v44, %v1914_v41  ;;  %v1952_v61 = vadd.f32 %v540_v39, %v528_v29  ;;  %v1954_v62 = vadd.f32 %v540_v39, %v531_v55 }
 0x1cb   : > { %v599_v63 = vrot.slane %v1924_v45, %v1911_v40  ;;  %v603_v0 = vrot.slane %v1926_v46, %v1914_v41  ;;  %v586_v1 = vsel %vm585_vm1, %v584_v57, %v579_v56  ;;  %v608_v3 = vrot.slane %v1928_v47, %v1911_v40 }
 0x1cc   : > { %v595_v2 = vsel %vm585_vm1, %v594_v60, %v590_v58  ;;  %v612_v4 = vrot.slane %v1930_v48, %v1914_v41  ;;  %v617_v8 = vrot.slane %v1932_v49, %v1911_v40  ;;  %v621_v9 = vrot.slane %v1934_v50, %v1914_v41 }
 0x1cd   : > { %v604_v5 = vsel %vm585_vm1, %v603_v0, %v599_v63  ;;  %v626_v12 = vrot.slane %v1936_v51, %v1911_v40  ;;  %v630_v21 = vrot.slane %v1938_v52, %v1914_v41  ;;  %v635_v22 = vrot.slane %v1940_v53, %v1911_v40 }
 0x1ce   : > { %v639_v23 = vrot.slane %v1942_v54, %v1914_v41  ;;  %v651_v24 = vsel %vm650_vm2, %v595_v2, %v586_v1  ;;  %v613_v29 = vsel %vm585_vm1, %v612_v4, %v608_v3  ;;  %v644_v59 = vrot.slane %v1952_v61, %v1911_v40 }
 0x1cf   : > { %v648_v30 = vrot.slane %v1954_v62, %v1914_v41  ;;  %v653_v31 = vsel %vm652_vm3, %v604_v5, %v651_v24  ;;  %v622_v33 = vsel %vm585_vm1, %v621_v9, %v617_v8  ;;  %v631_v35 = vsel %vm585_vm1, %v630_v21, %v626_v12 }
 0x1d0   : > { %v655_v34 = vsel %vm654_vm4, %v613_v29, %v653_v31  ;;  %v640_v38 = vsel %vm585_vm1, %v639_v23, %v635_v22  ;;  %v672_v60 = vsub.s32 0, %v1908_v36  ;;  %v2329_v63 = vsub.s32 3, %v1908_v36 }
 0x1d1   : > { %v657_v37 = vsel %vm656_vm5, %v622_v33, %v655_v34  ;;  %v649_v55 = vsel %vm585_vm1, %v648_v30, %v644_v59  ;;  %v676_v1 = vsub.s32 1, %v1908_v36  ;;  %v688_v4 = vsub.s32 4, %v1908_v36 }
 0x1d2   : > { %v659_v39 = vsel %vm658_vm6, %v631_v35, %v657_v37  ;;  %v2328_v21 = vsub.s32 5, %v1908_v36  ;;  %v2327_v59 = vsub.s32 6, %v1908_v36  ;;  %v700_v35 = vsub.s32 7, %v1908_v36 }
 0x1d3   : > { %v661_v56 = vsel %vm660_vm7, %v640_v38, %v659_v39 }
 0x1d4   : > { %v663_v57 = vsel %vm662_vm8, %v649_v55, %v661_v56 }
 0x1d5   : > { %v666_v58 = vsel %vm665_vm9, %v663_v57, -inf }
 0x1d6   : > { %667 = vmax.xlane.f32.xlu1 %v666_v58 }
 0x25f   : > { %v668_v0 = vpop.xlane.xlu1 %667 }
 0x260   : > { %v673_v2 = vrot.slane %v668_v0, %v672_v60  ;;  %v685_v5 = vrot.slane %v668_v0, %v2329_v63  ;;  %v677_v8 = vrot.slane %v668_v0, %v676_v1  ;;  %v689_v22 = vrot.slane %v668_v0, %v688_v4 }
 0x261   : > { %v693_v30 = vrot.slane %v668_v0, %v2328_v21  ;;  %v701_v55 = vrot.slane %v668_v0, %v700_v35 }
 0x262   : > { %v710_v3 = vsub.f32 %v1916_v32, %v673_v2  ;;  %v711_v9 = vsub.f32 %v1918_v42, %v673_v2  ;;  %v717_v23 = vsub.f32 %v1930_v48, %v685_v5  ;;  %v680_v32 = vsub.s32 2, %v1908_v36 }
 0x263   : > { %v712_v24 = vsub.f32 %v1920_v43, %v677_v8  ;;  %v719_v42 = vsub.f32 %v1934_v50, %v689_v22  ;;  %v713_v34 = vsub.f32 %v1922_v44, %v677_v8  ;;  %v697_v43 = vrot.slane %v668_v0, %v2327_v59 }
 0x264   : > { %v726_v12 = vmul.f32 1.442695, %v710_v3  ;;  %v728_v29 = vmul.f32 1.442695, %v711_v9  ;;  %v740_v31 = vmul.f32 1.442695, %v717_v23  ;;  %v681_v33 = vrot.slane %v668_v0, %v680_v32 }
 0x265   : > { %v730_v48 = vmul.f32 1.442695, %v712_v24  ;;  %v721_v37 = vsub.f32 %v1938_v52, %v693_v30  ;;  %v744_v38 = vmul.f32 1.442695, %v719_v42  ;;  %v732_v50 = vmul.f32 1.442695, %v713_v34 }
 0x266   : > { %1489 = vpow2.f32 %v726_v12  ;;  %v714_v39 = vsub.f32 %v1924_v45, %v681_v33  ;;  %v723_v44 = vsub.f32 %v1942_v54, %v697_v43  ;;  %v715_v57 = vsub.f32 %v1926_v46, %v681_v33 }
 0x267   : > { %1491 = vpow2.f32 %v728_v29  ;;  %v748_v56 = vmul.f32 1.442695, %v721_v37  ;;  %v725_v52 = vsub.f32 %v1954_v62, %v701_v55  ;;  %v716_v3 = vsub.f32 %v1928_v47, %v685_v5 }
 0x268   : > { %1493 = vpow2.f32 %v740_v31  ;;  %v734_v58 = vmul.f32 1.442695, %v714_v39  ;;  %v752_v45 = vmul.f32 1.442695, %v723_v44  ;;  %v736_v0 = vmul.f32 1.442695, %v715_v57 }
 0x269   : > { %1495 = vpow2.f32 %v730_v48  ;;  %v756_v46 = vmul.f32 1.442695, %v725_v52  ;;  %v718_v9 = vsub.f32 %v1932_v49, %v689_v22  ;;  %v738_v12 = vmul.f32 1.442695, %v716_v3 }
 0x26a   : > { %1497 = vpow2.f32 %v744_v38  ;;  %v720_v62 = vsub.f32 %v1936_v51, %v693_v30  ;;  %v722_v22 = vsub.f32 %v1940_v53, %v697_v43  ;;  %v724_v30 = vsub.f32 %v1952_v61, %v701_v55 }
 0x26b   : > { %1499 = vpow2.f32 %v732_v50  ;;  %v742_v5 = vmul.f32 1.442695, %v718_v9 }
 0x26c   : > { %1501 = vpow2.f32 %v748_v56  ;;  %v746_v29 = vmul.f32 1.442695, %v720_v62  ;;  %v750_v31 = vmul.f32 1.442695, %v722_v22  ;;  %v754_v34 = vmul.f32 1.442695, %v724_v30 }
 0x26d   : > { %1503 = vpow2.f32 %v734_v58 }
 0x26e   : > { %1505 = vpow2.f32 %v752_v45 }
 0x26f   : > { %1507 = vpow2.f32 %v736_v0 }
 0x270   : > { %1509 = vpow2.f32 %v756_v46 }
 0x271   : > { %1511 = vpow2.f32 %v738_v12 }
 0x272   : > { %1513 = vpow2.f32 %v742_v5 }
 0x273   : > { %v2030_v2 = vpop.eup %1489  ;;  %1515 = vpow2.f32 %v746_v29 }
 0x274   : > { %775 = vperm.xlu1 %1456, %v2030_v2   ;;  %v2035_v8 = vpop.eup %1491  ;;  %1517 = vpow2.f32 %v750_v31 }
 0x275   : > { %v2038_v54 = vpop.eup %1493  ;;  %1519 = vpow2.f32 %v754_v34 }
 0x276   : > { %v2041_v23 = vpop.eup %1495  ;;  %796 = vperm.xlu0 %1455, %v2038_v54  }
 0x277   : > { %v2045_v47 = vpop.eup %1497 }
 0x278   : > { %778 = vperm.xlu1 %1456, %v2035_v8   ;;  %v2048_v24 = vpop.eup %1499 }
 0x279   : > { %v2052_v49 = vpop.eup %1501 }
 0x27a   : > { %802 = vperm.xlu0 %1455, %v2045_v47   ;;  %v2055_v42 = vpop.eup %1503 }
 0x27b   : > { %v2059_v51 = vpop.eup %1505 }
 0x27c   : > { %781 = vperm.xlu1 %1456, %v2041_v23   ;;  %v2062_v33 = vpop.eup %1507 }
 0x27d   : > { %v2066_v53 = vpop.eup %1509 }
 0x27e   : > { %808 = vperm.xlu0 %1455, %v2052_v49   ;;  %v2068_v48 = vpop.eup %1511 }
 0x27f   : > { %v2072_v61 = vpop.eup %1513 }
 0x280   : > { %784 = vperm.xlu1 %1456, %v2048_v24   ;;  %v2075_v43 = vpop.eup %1515 }
 0x281   : > { %v2078_v37 = vpop.eup %1517 }
 0x282   : > { %814 = vperm.xlu0 %1455, %v2059_v51   ;;  %v1520_v38 = vpop.eup %1519 }
 0x284   : > { %787 = vperm.xlu1 %1456, %v2055_v42  }
 0x286   : > { %820 = vperm.xlu0 %1455, %v2066_v53  }
 0x288   : > { %790 = vperm.xlu1 %1456, %v2062_v33  }
 0x28c   : > { %793 = vperm.xlu1 %1456, %v2068_v48  }
 0x290   : > { %799 = vperm.xlu1 %1456, %v2072_v61  }
 0x294   : > { %805 = vperm.xlu1 %1456, %v2075_v43  }
 0x298   : > { %811 = vperm.xlu1 %1456, %v2078_v37  }
 0x29c   : > { %817 = vperm.xlu1 %1456, %v1520_v38  }
 0x2ef   : > { %v776_v39 = vpop.permute.xlu1 %775 }
 0x2f0   : > { %v825_v59 = vrot.slane %v776_v39, %v1911_v40 }
 0x2f1   : > { %v797_v56 = vpop.permute.xlu0 %796 }
 0x2f2   : > { %v856_v34 = vrot.slane %v797_v56, %v1914_v41 }
 0x2f3   : > { %v779_v50 = vpop.permute.xlu1 %778 }
 0x2f4   : > { %v829_v5 = vrot.slane %v779_v50, %v1914_v41 }
 0x2f5   : > { %v803_v58 = vpop.permute.xlu0 %802 }
 0x2f7   : > { %v782_v55 = vpop.permute.xlu1 %781 }
 0x2f8   : > { %v834_v22 = vrot.slane %v782_v55, %v1911_v40  ;;  %v830_v55 = vsel %vm585_vm1, %v829_v5, %v825_v59 }
 0x2f9   : > { %v809_v3 = vpop.permute.xlu0 %808 }
 0x2fb   : > { %v785_v44 = vpop.permute.xlu1 %784 }
 0x2fc   : > { %v838_v46 = vrot.slane %v785_v44, %v1914_v41 }
 0x2fd   : > { %v815_v9 = vpop.permute.xlu0 %814 }
 0x2fe   : > { %v839_v44 = vsel %vm585_vm1, %v838_v46, %v834_v22  ;;  %v883_v56 = vrot.slane %v815_v9, %v1914_v41 }
 0x2ff   : > { %v788_v57 = vpop.permute.xlu1 %787  ;;  %v894_v39 = vsel %vm650_vm2, %v839_v44, %v830_v55 }
 0x300   : > { %v843_v30 = vrot.slane %v788_v57, %v1911_v40 }
 0x301   : > { %v821_v46 = vpop.permute.xlu0 %820 }
 0x302   : > { %v892_v5 = vrot.slane %v821_v46, %v1914_v41 }
 0x303   : > { %v791_v52 = vpop.permute.xlu1 %790 }
 0x304   : > { %v847_v12 = vrot.slane %v791_v52, %v1914_v41  ;;  %v865_v52 = vrot.slane %v803_v58, %v1914_v41 }
 0x306   : > { %v848_v50 = vsel %vm585_vm1, %v847_v12, %v843_v30 }
 0x307   : > { %v794_v45 = vpop.permute.xlu1 %793  ;;  %v895_v58 = vsel %vm652_vm3, %v848_v50, %v894_v39 }
 0x308   : > { %v852_v29 = vrot.slane %v794_v45, %v1911_v40  ;;  %v874_v45 = vrot.slane %v809_v3, %v1914_v41 }
 0x30a   : > { %v857_v57 = vsel %vm585_vm1, %v856_v34, %v852_v29 }
 0x30b   : > { %v800_v0 = vpop.permute.xlu1 %799  ;;  %v896_v22 = vsel %vm654_vm4, %v857_v57, %v895_v58  ;;  %v2338_v58 = vsub.s32 6, %v1908_v36 }
 0x30c   : > { %v861_v31 = vrot.slane %v800_v0, %v1911_v40 }
 0x30f   : > { %v806_v62 = vpop.permute.xlu1 %805 }
 0x310   : > { %v870_v21 = vrot.slane %v806_v62, %v1911_v40  ;;  %v866_v62 = vsel %vm585_vm1, %v865_v52, %v861_v31 }
 0x312   : > { %v875_v12 = vsel %vm585_vm1, %v874_v45, %v870_v21 }
 0x313   : > { %v812_v63 = vpop.permute.xlu1 %811 }
 0x314   : > { %v879_v0 = vrot.slane %v812_v63, %v1911_v40  ;;  %v897_v63 = vsel %vm656_vm5, %v866_v62, %v896_v22 }
 0x315   : > { %v898_v29 = vsel %vm658_vm6, %v875_v12, %v897_v63 }
 0x316   : > { %v884_v59 = vsel %vm585_vm1, %v883_v56, %v879_v0 }
 0x317   : > { %v818_v3 = vpop.permute.xlu1 %817  ;;  %v899_v31 = vsel %vm660_vm7, %v884_v59, %v898_v29 }
 0x318   : > { %v888_v9 = vrot.slane %v818_v3, %v1911_v40 }
 0x31a   : > { %v893_v30 = vsel %vm585_vm1, %v892_v5, %v888_v9 }
 0x31b   : > { %v900_v34 = vsel %vm662_vm8, %v893_v30, %v899_v31 }
 0x31c   : > { %v902_v21 = vsel %vm665_vm9, %v900_v34, 0.0 }
 0x31d   : > { %903 = vadd.xlane.f32.xlu1 %v902_v21 }
 0x3a6   : > { %v904_v44 = vpop.xlane.xlu1 %903 }
 0x3a7   : > { %1521 = vrcp.f32 %v904_v44 }
 0x3b4   : > { %v1522_v52 = vpop.eup %1521 }
 0x3b5   : > { %v926_v50 = vrot.slane %v1522_v52, %v688_v4  ;;  %v910_v55 = vrot.slane %v1522_v52, %v672_v60  ;;  %v938_v0 = vrot.slane %v1522_v52, %v700_v35  ;;  %v914_v46 = vrot.slane %v1522_v52, %v676_v1 }
 0x3b6   : > { %v934_v12 = vrot.slane %v1522_v52, %v2338_v58 }
 0x3b7   : > { %v956_v45 = vmul.f32 %v2045_v47, %v926_v50  ;;  %v947_v57 = vmul.f32 %v2030_v2, %v910_v55  ;;  %v961_v56 = vmul.f32 %v1520_v38, %v938_v0  ;;  %v948_v39 = vmul.f32 %v2035_v8, %v910_v55 }
 0x3b8   : > { %v949_v4 = vmul.f32 %v2041_v23, %v914_v46  ;;  %v950_v60 = vmul.f32 %v2048_v24, %v914_v46  ;;  %v918_v2 = vrot.slane %v1522_v52, %v680_v32  ;;  %v2336_v8 = vsub.s32 3, %v1908_v36 }
 0x3b9   : > { %1010 = vperm.xlu1 %1456, %v956_v45   ;;  %965 = vperm.xlu0 %1455, %v947_v57   ;;  %v955_v24 = vmul.f32 %v2072_v61, %v926_v50  ;;  %v2337_v32 = vsub.s32 5, %v1908_v36  ;;  %v962_v61 = vmul.f32 %v2066_v53, %v938_v0 }
 0x3ba   : > { %v951_v35 = vmul.f32 %v2055_v42, %v918_v2  ;;  %v952_v47 = vmul.f32 %v2062_v33, %v918_v2  ;;  %v922_v38 = vrot.slane %v1522_v52, %v2336_v8 }
 0x3bb   : > { %v930_v62 = vrot.slane %v1522_v52, %v2337_v32 }
 0x3bc   : > { %v953_v1 = vmul.f32 %v2068_v48, %v922_v38  ;;  %v954_v23 = vmul.f32 %v2038_v54, %v922_v38  ;;  %v959_v48 = vmul.f32 %v2078_v37, %v934_v12  ;;  %v960_v54 = vmul.f32 %v2059_v51, %v934_v12 }
 0x3bd   : > { %1035 = vperm.xlu1 %1456, %v961_v56   ;;  %970 = vperm.xlu0 %1455, %v948_v39   ;;  %v957_v42 = vmul.f32 %v2075_v43, %v930_v62  ;;  %v958_v33 = vmul.f32 %v2052_v49, %v930_v62 }
 0x3c1   : > { %975 = vperm.xlu0 %1455, %v949_v4  }
 0x3c5   : > { %980 = vperm.xlu0 %1455, %v950_v60  }
 0x3c9   : > { %985 = vperm.xlu0 %1455, %v951_v35  }
 0x3cd   : > { %990 = vperm.xlu0 %1455, %v952_v47  }
 0x3d1   : > { %995 = vperm.xlu0 %1455, %v953_v1  }
 0x3d5   : > { %1000 = vperm.xlu0 %1455, %v954_v23  }
 0x3d9   : > { %1005 = vperm.xlu0 %1455, %v955_v24  }
 0x3dd   : > { %1015 = vperm.xlu0 %1455, %v957_v42  }
 0x3e1   : > { %1020 = vperm.xlu0 %1455, %v958_v33  }
 0x3e5   : > { %1025 = vperm.xlu0 %1455, %v959_v48  }
 0x3e9   : > { %1030 = vperm.xlu0 %1455, %v960_v54  }
 0x3ed   : > { %1040 = vperm.xlu0 %1455, %v962_v61  }
 0x434   : > { %v2144_v22 = vpop.permute.xlu0 %965  ;;  %v2170_v31 = vpop.permute.xlu1 %1010 }
 0x435   : > { %v1043_v51 = vmul.f32 %v2144_v22, %v1779_v6  ;;  %v1052_v57 = vmul.f32 %v2170_v31, %v1790_v11  ;;  %v1191_v8 = vrot.slane %v2170_v31, %v1914_v41  ;;  %v1151_v38 = vrot.slane %v2144_v22, %v1911_v40 }
 0x437   : > { %v1059_v29 = vsel %vm323_vm0, %v1043_v51, 0.0  ;;  %v1096_v2 = vsel %vm323_vm0, %v1052_v57, 0.0 }
 0x438   : > { %v2146_v59 = vpop.permute.xlu0 %970  ;;  %v2189_v0 = vpop.permute.xlu1 %1035 }
 0x439   : > { %v1044_v37 = vmul.f32 %v2146_v59, %v1782_v7  ;;  %v1155_v62 = vrot.slane %v2146_v59, %v1914_v41  ;;  %v1214_v33 = vrot.slane %v2189_v0, %v1911_v40 }
 0x43b   : > { %v1060_v63 = vsel %vm323_vm0, %v1044_v37, 0.0 }
 0x43c   : > { %v2148_v43 = vpop.permute.xlu0 %975  ;;  %v1061_v7 = vadd.f32 %v1060_v63, %v1059_v29 }
 0x43d   : > { %v1045_v9 = vmul.f32 %v2148_v43, %v1795_v13  ;;  %v1160_v48 = vrot.slane %v2148_v43, %v1911_v40 }
 0x43e   : > { %v1062_v50 = vrot.slane %v1061_v7, 4 }
 0x43f   : > { %v1068_v21 = vsel %vm323_vm0, %v1045_v9, 0.0 }
 0x440   : > { %v2150_v49 = vpop.permute.xlu0 %980  ;;  %v1063_v60 = vadd.f32 %v1062_v50, %v1061_v7 }
 0x441   : > { %v1046_v5 = vmul.f32 %v2150_v49, %v1798_v14 }
 0x442   : > { %v1064_v32 = vrot.slane %v1063_v60, 2 }
 0x443   : > { %v1069_v34 = vsel %vm323_vm0, %v1046_v5, 0.0  ;;  %v1156_v5 = vsel %vm585_vm1, %v1155_v62, %v1151_v38 }
 0x444   : > { %v2152_v36 = vpop.permute.xlu0 %985  ;;  %v1070_v44 = vadd.f32 %v1069_v34, %v1068_v21 }
 0x445   : > { %v1047_v14 = vmul.f32 %v2152_v36, %v1807_v17  ;;  %v1169_v59 = vrot.slane %v2152_v36, %v1911_v40 }
 0x446   : > { %v1071_v56 = vrot.slane %v1070_v44, 4 }
 0x447   : > { %v1077_v17 = vsel %vm323_vm0, %v1047_v14, 0.0 }
 0x448   : > { %v2154_v3 = vpop.permute.xlu0 %990  ;;  %v1072_v1 = vadd.f32 %v1071_v56, %v1070_v44 }
 0x449   : > { %v1048_v6 = vmul.f32 %v2154_v3, %v1810_v18  ;;  %v1173_v58 = vrot.slane %v2154_v3, %v1914_v41  ;;  %v2222_v3 = vadd.f32 %v1064_v32, %v1063_v60 }
 0x44b   : > { %v1078_v55 = vsel %vm323_vm0, %v1048_v6, 0.0  ;;  %v1174_v9 = vsel %vm585_vm1, %v1173_v58, %v1169_v59  ;;  %v1066_v58 = vrot.slane %v2222_v3, 1 }
 0x44c   : > { %v2160_v53 = vpop.permute.xlu0 %995  ;;  %v1079_v39 = vadd.f32 %v1078_v55, %v1077_v17 }
 0x44d   : > { %v1049_v45 = vmul.f32 %v2160_v53, %v1831_v25  ;;  %v1178_v7 = vrot.slane %v2160_v53, %v1911_v40 }
 0x44e   : > { %v1080_v23 = vrot.slane %v1079_v39, 4 }
 0x44f   : > { %v1086_v25 = vsel %vm323_vm0, %v1049_v45, 0.0 }
 0x450   : > { %v2168_v30 = vpop.permute.xlu0 %1000 }
 0x451   : > { %v1050_v13 = vmul.f32 %v2168_v30, %v1835_v26  ;;  %v1182_v63 = vrot.slane %v2168_v30, %v1914_v41 }
 0x453   : > { %v1087_v26 = vsel %vm323_vm0, %v1050_v13, 0.0 }
 0x454   : > { %v2180_v52 = vpop.permute.xlu0 %1005  ;;  %v1088_v11 = vadd.f32 %v1087_v26, %v1086_v25 }
 0x455   : > { %v1051_v18 = vmul.f32 %v2180_v52, %v1787_v10  ;;  %v1057_v10 = vmul.f32 %v2189_v0, %v1839_v27  ;;  %v1164_v27 = vrot.slane %v2150_v49, %v1914_v41  ;;  %v1081_v49 = vadd.f32 %v1080_v23, %v1079_v39 }
 0x456   : > { %v1089_v12 = vrot.slane %v1088_v11, 4  ;;  %v1187_v36 = vrot.slane %v2180_v52, %v1911_v40  ;;  %v1183_v52 = vsel %vm585_vm1, %v1182_v63, %v1178_v7 }
 0x457   : > { %v1095_v46 = vsel %vm323_vm0, %v1051_v18, 0.0  ;;  %v1165_v43 = vsel %vm585_vm1, %v1164_v27, %v1160_v48  ;;  %v1082_v13 = vrot.slane %v1081_v49, 2 }
 0x458   : > { %v1016_v4 = vpop.permute.xlu0 %1015  ;;  %v1097_v35 = vadd.f32 %v1096_v2, %v1095_v46  ;;  %v1090_v29 = vadd.f32 %v1089_v12, %v1088_v11  ;;  %v1220_v30 = vsel %vm650_vm2, %v1165_v43, %v1156_v5  ;;  %v1192_v57 = vsel %vm585_vm1, %v1191_v8, %v1187_v36 }
 0x459   : > { %v1053_v47 = vmul.f32 %v1016_v4, %v1801_v15  ;;  %v2209_v15 = vsel %vm323_vm0, %v1057_v10, 0.0  ;;  %v1196_v55 = vrot.slane %v1016_v4, %v1911_v40  ;;  %v1083_v2 = vadd.f32 %v1082_v13, %v1081_v49 }
 0x45a   : > { %v1098_v54 = vrot.slane %v1097_v35, 4  ;;  %v1091_v18 = vrot.slane %v1090_v29, 2 }
 0x45b   : > { %v1104_v61 = vsel %vm323_vm0, %v1053_v47, 0.0 }
 0x45c   : > { %v1021_v24 = vpop.permute.xlu0 %1020  ;;  %v1099_v34 = vadd.f32 %v1098_v54, %v1097_v35  ;;  %v1092_v47 = vadd.f32 %v1091_v18, %v1090_v29 }
 0x45d   : > { %v1054_v42 = vmul.f32 %v1021_v24, %v1804_v16  ;;  %v1073_v16 = vrot.slane %v1072_v1, 2  ;;  %v1200_v6 = vrot.slane %v1021_v24, %v1914_v41 }
 0x45e   : > { %v1100_v17 = vrot.slane %v1099_v34, 2  ;;  %v1093_v12 = vrot.slane %v1092_v47, 1 }
 0x45f   : > { %v1105_v22 = vsel %vm323_vm0, %v1054_v42, 0.0  ;;  %v1074_v14 = vadd.f32 %v1073_v16, %v1072_v1  ;;  %v1201_v26 = vsel %vm585_vm1, %v1200_v6, %v1196_v55  ;;  %v1084_v42 = vrot.slane %v1083_v2, 1 }
 0x460   : > { %v1106_v37 = vadd.f32 %v1105_v22, %v1104_v61  ;;  %v1026_v51 = vpop.permute.xlu0 %1025  ;;  %v1101_v1 = vadd.f32 %v1100_v17, %v1099_v34 }
 0x461   : > { %v1055_v21 = vmul.f32 %v1026_v51, %v1813_v19  ;;  %v1221_v19 = vsel %vm652_vm3, %v1174_v9, %v1220_v30  ;;  %v1205_v0 = vrot.slane %v1026_v51, %v1911_v40  ;;  %v1075_v35 = vrot.slane %v1074_v14, 1 }
 0x462   : > { %v1107_v31 = vrot.slane %v1106_v37, 4  ;;  %v1222_v46 = vsel %vm654_vm4, %v1183_v52, %v1221_v19  ;;  %v1102_v61 = vrot.slane %v1101_v1, 1  ;;  %v1085_v49 = vadd.f32 %v1084_v42, %v1083_v2 }
 0x463   : > { %v1113_v56 = vsel %vm323_vm0, %v1055_v21, 0.0  ;;  %v1223_v10 = vsel %vm656_vm5, %v1192_v57, %v1222_v46  ;;  %v1076_v22 = vadd.f32 %v1075_v35, %v1074_v14 }
 0x464   : > { %v1108_v44 = vadd.f32 %v1107_v31, %v1106_v37  ;;  %v1031_v50 = vpop.permute.xlu0 %1030  ;;  %v1224_v8 = vsel %vm658_vm6, %v1201_v26, %v1223_v10  ;;  %v1094_v37 = vadd.f32 %v1093_v12, %v1092_v47  ;;  %v1103_v43 = vadd.f32 %v1102_v61, %v1101_v1 }
 0x465   : > { %v1056_v53 = vmul.f32 %v1031_v50, %v1816_v20  ;;  %v1209_v45 = vrot.slane %v1031_v50, %v1914_v41 }
 0x466   : > { %v1109_v20 = vrot.slane %v1108_v44, 2 }
 0x467   : > { %v1114_v39 = vsel %vm323_vm0, %v1056_v53, 0.0  ;;  %v1210_v60 = vsel %vm585_vm1, %v1209_v45, %v1205_v0 }
 0x468   : > { %v1115_v4 = vadd.f32 %v1114_v39, %v1113_v56  ;;  %v1041_v25 = vpop.permute.xlu0 %1040  ;;  %v1225_v23 = vsel %vm660_vm7, %v1210_v60, %v1224_v8 }
 0x469   : > { %v1058_v40 = vmul.f32 %v1041_v25, %v1842_v28  ;;  %v1218_v11 = vrot.slane %v1041_v25, %v1914_v41  ;;  %v1110_v28 = vadd.f32 %v1109_v20, %v1108_v44 }
 0x46a   : > { %v1116_v38 = vrot.slane %v1115_v4, 4 }
 0x46b   : > { %v1123_v24 = vsel %vm323_vm0, %v1058_v40, 0.0  ;;  %v1219_v32 = vsel %vm585_vm1, %v1218_v11, %v1214_v33  ;;  %v1111_v16 = vrot.slane %v1110_v28, 1 }
 0x46c   : > { %v1117_v62 = vadd.f32 %v1116_v38, %v1115_v4  ;;  %v1124_v41 = vadd.f32 %v1123_v24, %v2209_v15  ;;  %v1226_v27 = vsel %vm662_vm8, %v1219_v32, %v1225_v23  ;;  %v1067_v15 = vadd.f32 %v1066_v58, %v2222_v3 }
 0x46d   : > { %1228 = vst.msk [vmem:[%s284_s19] sm:$0xff] %vm665_vm9, %v1226_v27  ;;  %v1112_v9 = vadd.f32 %v1111_v16, %v1110_v28 }
 0x46e   : > { %v1118_v48 = vrot.slane %v1117_v62, 2  ;;  %v1125_v54 = vrot.slane %v1124_v41, 4  ;;  %v1139_v63 = vsel %vm650_vm2, %v1076_v22, %v1067_v15 }
 0x46f   : > { %v1140_v36 = vsel %vm652_vm3, %v1085_v49, %v1139_v63 }
 0x470   : > { %v1119_v59 = vadd.f32 %v1118_v48, %v1117_v62  ;;  %v1126_v33 = vadd.f32 %v1125_v54, %v1124_v41  ;;  %v1141_v7 = vsel %vm654_vm4, %v1094_v37, %v1140_v36 }
 0x471   : > { %v1142_v3 = vsel %vm656_vm5, %v1103_v43, %v1141_v7 }
 0x472   : > { %v1120_v51 = vrot.slane %v1119_v59, 1  ;;  %v1127_v5 = vrot.slane %v1126_v33, 2  ;;  %v1143_v21 = vsel %vm658_vm6, %v1112_v9, %v1142_v3 }
 0x474   : > { %v1128_v29 = vadd.f32 %v1127_v5, %v1126_v33  ;;  %v1121_v31 = vadd.f32 %v1120_v51, %v1119_v59 }
 0x476   : > { %v1129_v34 = vrot.slane %v1128_v29, 1  ;;  %v1144_v14 = vsel %vm660_vm7, %v1121_v31, %v1143_v21 }
 0x478   : > { %v1130_v6 = vadd.f32 %v1129_v34, %v1128_v29 }
 0x47a   : > { %v1145_v30 = vsel %vm662_vm8, %v1130_v6, %v1144_v14 }
 0x47b   : > { %1147 = vst.msk [vmem:[%s273_s13] sm:$0xff] %vm323_vm0, %v1145_v30 }
 0x47c   : > { %1564 = shalt.err (!%p1561_p13)
}
 0x47d   : > { %s1565_s30 = scalar_lea.hbm %s2280_s15, 128  ;;  %s1569_s17 = scalar_lea.hbm %s2323_s5, 512 }
 0x47e   : > { %p1566_p1 = scmp.ne.s32.totalorder %s2280_s15, %s1565_s30  ;;  %p1570_p3 = scmp.lt.s32.totalorder %s2280_s15, %s2323_s5 }
 0x47f   : > { %p1571_p6 = scmp.lt.s32.totalorder %s1569_s17, %s1565_s30 }
 0x480   : > { %p1567_p0 = pnand %p1566_p1, %p2339_p12 }
 0x481   : > { %p1572_p10 = por %p1571_p6, %p1570_p3 }
 0x482   : > { %p1568_p2 = pneg %p1567_p0 }
 0x484   : > { %p1573_p11 = pnand %p1572_p10, %p1568_p2 }
 0x486   : > { %1576 = shalt.err (!%p1573_p11)
}
 0x487   : > { %1408 = dma.vmem_to_hbm [thread:$0]  (%p2339_p12), %s1248_s12, 128, %s2280_s15, %s1230_s4  }
 0x488 PF: > { %p1419_p4 = scmp.ge.s32.totalorder %s1615_s26, 2  ;;  %s1262_s21 = sand.u32 1, %s1603_s23  }
 0x489   : > { %p2340_p5 = scmp.ne.s32.totalorder %s2333_s11, 0  ;;  %s1263_s13 = scalar_lea.sflag [#allocation5], %s1262_s21 }
 0x48b   : > { %p1415_p7 = pnand %p1419_p4, %p2340_p5 }
 0x48d   : > { %p1416_p8 = pneg %p1415_p7 }
 0x48f   : > { %1598 = dma.done.wait (%p1416_p8), %s1263_s13, 128  }
 0x490   : > { %1600 = vsyncadd (%p1416_p8), %s1263_s13, 4294967168  ;;  %p22_p9 = scmp.ge.s32.totalorder %s1685_s28, 6   ;;  %s2341_s23 = smov %s1607_s24 }
 0x491   : > { %s2342_s24 = smov %s1611_s25  ;;  %s2343_s25 = smov %s1697_s7 }
 0x492   : > { %s2344_s26 = smov %s1685_s28  ;;  %24 = sbr.rel (!%p22_p9) target bundleno = 8 (0x8), region = 97 }
 0x497   :  { %1275 = vsyncpa [#allocation4], 1 }
 0x498   :  { %1277 = vsyncpa [#allocation4 + $0x1], 1 }
 0x499   :  { %1278 = vsyncpa [#allocation5], 1 }
 0x49a   :  { %1280 = vsyncpa [#allocation5 + $0x1], 1 }

</bundles_post_ra>
